<compile_context>
chip_gen: v7x
topology: tpu7x:2x2x1
jax: 0.10.0
libtpu: 0.0.40
codegen_flags: <defaults>
</compile_context>

<pallas_src>
import functools

import jax
import jax.numpy as jnp
from jax.experimental import pallas as pl
from jax.experimental.pallas import tpu as pltpu


def _round_up(x, m):
    return ((x + m - 1) // m) * m


def _tpu_tuning():
    """Returns (preferred Cout tile, pipeline VMEM budget, default vmem limit)."""
    kind = ""
    try:
        kind = jax.devices()[0].device_kind.lower()
    except Exception:
        pass
    narrow_mxu = any(g in kind for g in ("v2", "v3", "v4", "v5"))  # 128-wide MXU
    big_vmem = narrow_mxu or ("v6" in kind)                        # 128 MiB VMEM
    prefer_tc = 128 if narrow_mxu else 256
    if big_vmem:
        return prefer_tc, 64 << 20, 100 << 20
    # v7x (64 MiB VMEM) or unknown generation: stay conservative.
    return prefer_tc, 24 << 20, 48 << 20


def _conv3x3_kernel(x_ref, w_ref, b_ref, o_ref, *, stride, th):
    """One (batch, H-tile, Cout-tile) per grid step.

    x_ref : (1, 1, Rblk, Wt, K)  tap-folded NHWC input tile (K = 3*Cin).
                                 stride=1: rows [0, th+2) with a 2-row halo.
                                 stride=2: rows [0, th+1)      = even rows,
                                           rows [th+1, 2*th+1) = odd rows.
    w_ref : (3, K, TC)           weights, kh-major, kw folded into K.
    b_ref : (1, TC)              bias tile.
    o_ref : (1, th, Wt, TC)      output tile at full padded width Wt
                                 (lane-dense TC -> unmasked stores).
    """
    _, _, _, Wt, K = x_ref.shape
    TC = o_ref.shape[-1]

    x = x_ref[0, 0]                                  # (Rblk, Wt, K)
    if stride == 1:
        starts = (0, 1, 2)                           # halo rows
    else:
        starts = (0, th + 1, 1)                      # even / odd / even+1 plane

    acc = jnp.zeros((th * Wt, TC), jnp.float32)
    # 3 MXU matmuls (one per kh); the kw taps already live in the K axis.
    # TODO(synk): concat the taps along K (single deeper dot) when 3*Cin
    #   underfills the MXU contraction depth to drop the two VALU acc passes.
    for kh in range(3):
        xk = x[starts[kh]:starts[kh] + th]           # leading-axis slice only
        acc = acc + jnp.dot(xk.reshape(th * Wt, K), w_ref[kh],
                            preferred_element_type=jnp.float32)

    acc = acc + b_ref[0].astype(jnp.float32)[None, :]
    # Full-width store: Wo/Ho/Cout cropping happens in the wrapper (XLA slice).
    o_ref[0] = acc.reshape(th, Wt, TC).astype(o_ref.dtype)


@functools.partial(jax.jit, static_argnames=("downsample", "tile_rows"))
def conv2d3x3(x_nchw, w_oihw, bias, downsample=False, tile_rows=None):
    """Equivalent of Conv2d3x3.forward: nn.Conv2d(k=3, padding=1, stride=1|2)."""
    N, Cin, H, W = x_nchw.shape
    Cout = w_oihw.shape[0]
    stride = 2 if downsample else 1

    Ho = (H + 2 - 3) // stride + 1
    Wo = (W + 2 - 3) // stride + 1
    K = 3 * Cin

    x_bytes = jnp.dtype(x_nchw.dtype).itemsize
    w_bytes = jnp.dtype(w_oihw.dtype).itemsize
    b_bytes = jnp.dtype(bias.dtype).itemsize

    prefer_tc, budget, vmem_limit = _tpu_tuning()

    # Lane-dense Cout tile: 256 fills the 2x256x256 MXU on v6e/v7x; fall back
    # to 128 for small / non-256-divisible Cout and on 128-wide-MXU parts.
    c128 = _round_up(Cout, 128)
    TC = 256 if (prefer_tc == 256 and c128 % 256 == 0) else 128
    Cout_p = _round_up(Cout, TC)

    # Dtype-aware sublane padding of the in-kernel W axis (8/16/32 for 4/2/1 B)
    # keeps the (th, Wt, K) -> (th*Wt, K) reshape and the output store
    # relayout-free for packed dtypes too.
    sub = 8 * max(1, 4 // x_bytes)
    Wt = _round_up(Wo, sub)

    # --- H tiling: largest output-row tile whose pipeline footprint fits ----
    def _footprint(th):
        rblk = stride * th + (3 - stride)            # th+2 rows / 2*th+1 rows
        x_blk = rblk * Wt * K * x_bytes
        o_blk = th * Wt * TC * x_bytes
        w_blk = 3 * K * TC * w_bytes + TC * b_bytes
        return 2 * (x_blk + o_blk + w_blk)           # double-buffered

    TH = Ho if tile_rows is None else max(1, min(int(tile_rows), Ho))
    while TH > 1 and _footprint(TH) > budget:
        TH = (TH + 1) // 2
    nH = -(-Ho // TH)
    Ho_p = nH * TH
    vmem_limit = int(min(max(vmem_limit, _footprint(TH) + (8 << 20)), 100 << 20))

    # --- wrapper-side layout: NCHW -> NHWC, zero-pad, fold kw taps into K ---
    Hp_total = stride * Ho_p + 2                     # 1 top pad + bottom slack
    x_nhwc = jnp.transpose(x_nchw, (0, 2, 3, 1))
    x_pad = jnp.pad(x_nhwc, ((0, 0), (1, Hp_total - H - 1), (1, 1), (0, 0)))

    # x_sh[n, h, wo, kw*Cin + c] = x_pad[n, h, stride*wo + kw, c]
    cols = [x_pad[:, :, kw::stride, :][:, :, :Wo, :] for kw in range(3)]
    x_sh = jnp.concatenate(cols, axis=-1)            # (N, Hp_total, Wo, K)
    if Wt > Wo:
        x_sh = jnp.pad(x_sh, ((0, 0), (0, 0), (0, Wt - Wo), (0, 0)))

    # Materialize H tiles: 2-row halo for stride=1; pre-split even/odd row
    # planes for stride=2 so the kernel never decimates rows in VMEM.
    tiles = []
    for h in range(nH):
        r0 = stride * h * TH
        if stride == 1:
            t = x_sh[:, r0:r0 + TH + 2]
        else:
            even = x_sh[:, r0:r0 + 2 * TH + 1:2]     # TH+1 rows (taps kh=0,2)
            odd = x_sh[:, r0 + 1:r0 + 2 * TH:2]      # TH   rows (tap  kh=1)
            t = jnp.concatenate([even, odd], axis=1)
        tiles.append(t)
    x_tiled = jnp.stack(tiles, axis=1)               # (N, nH, Rblk, Wt, K)
    Rblk = x_tiled.shape[2]

    # Weights: (Cout, Cin, 3, 3) -> (kh, kw*Cin + c, Cout_p); bias -> (1, Cout_p)
    w_t = jnp.transpose(w_oihw, (2, 3, 1, 0))        # (kh, kw, Cin, Cout)
    w_k = jnp.pad(w_t.reshape(3, K, Cout), ((0, 0), (0, 0), (0, Cout_p - Cout)))
    b_p = jnp.pad(bias, (0, Cout_p - Cout)).reshape(1, Cout_p)

    kernel = functools.partial(_conv3x3_kernel, stride=stride, th=TH)

    flops = 2 * N * Ho * Wo * Cout * 9 * Cin
    bytes_accessed = (int(x_tiled.size) * x_bytes + int(w_k.size) * w_bytes
                      + int(b_p.size) * b_bytes + N * Ho_p * Wt * Cout_p * x_bytes)

    # Grid order (n, h, c): x is only re-DMA'd when (n, h) changes; the small
    # weight/bias tiles are the only per-step DMA.  No cross-step accumulator,
    # so all grid axes are "parallel" (megacore-shardable).
    out_nhwc = pl.pallas_call(
        kernel,
        out_shape=jax.ShapeDtypeStruct((N, Ho_p, Wt, Cout_p), x_nchw.dtype),
        grid_spec=pltpu.PrefetchScalarGridSpec(
            num_scalar_prefetch=0,
            grid=(N, nH, Cout_p // TC),
            in_specs=[
                pl.BlockSpec((1, 1, Rblk, Wt, K), lambda n, h, c: (n, h, 0, 0, 0)),
                pl.BlockSpec((3, K, TC), lambda n, h, c: (0, 0, c)),
                pl.BlockSpec((1, TC), lambda n, h, c: (0, c)),
            ],
            out_specs=pl.BlockSpec((1, TH, Wt, TC), lambda n, h, c: (n, h, 0, c)),
        ),
        compiler_params=pltpu.CompilerParams(
            dimension_semantics=("parallel", "parallel", "parallel"),
            vmem_limit_bytes=vmem_limit),
        cost_estimate=pl.CostEstimate(flops=flops, transcendentals=0,
                                      bytes_accessed=bytes_accessed),
    )(x_tiled, w_k, b_p)

    # Cheap XLA crops of the padded rows / width / channels, then NHWC -> NCHW.
    out = out_nhwc[:, :Ho, :Wo, :Cout]
    return jnp.transpose(out, (0, 3, 1, 2))


def init_conv2d3x3_params(key, in_channels, out_channels):
    """Deterministic init with the same shapes/scale as torch's default."""
    kw, kb = jax.random.split(key)
    fan_in = in_channels * 3 * 3
    bound = 1.0 / jnp.sqrt(fan_in)
    weight = jax.random.uniform(
        kw, (out_channels, in_channels, 3, 3), jnp.float32, -bound, bound)
    bias = jax.random.uniform(kb, (out_channels,), jnp.float32, -bound, bound)
    return weight, bias


def _ref_conv(x, w, b, stride):
    return jax.lax.conv_general_dilated(
        x, w, window_strides=(stride, stride), padding=((1, 1), (1, 1)),
        dimension_numbers=("NCHW", "OIHW", "NCHW")) + b[None, :, None, None]


if __name__ == "__main__":
    key = jax.random.PRNGKey(0)
    k_x, k_p, k_x2, k_p2 = jax.random.split(key, 4)

    N, Cin, H, W = 2, 4, 16, 16
    Cout = 8
    x = jax.random.normal(k_x, (N, Cin, H, W), jnp.float32)
    weight, bias = init_conv2d3x3_params(k_p, Cin, Cout)

    def _check(out, ref, shape):
        assert out.shape == shape, (out.shape, shape)
        err = float(jnp.max(jnp.abs(out - ref)))
        assert jnp.allclose(out, ref, atol=1e-4, rtol=1e-4), err

    # stride=1 and stride=2, single H tile.
    out = jax.block_until_ready(conv2d3x3(x, weight, bias, downsample=False))
    _check(out, _ref_conv(x, weight, bias, 1), (N, Cout, H, W))

    out_ds = jax.block_until_ready(conv2d3x3(x, weight, bias, downsample=True))
    _check(out_ds, _ref_conv(x, weight, bias, 2), (N, Cout, H // 2, W // 2))

    # Force H tiling (halo / even-odd row-plane paths) with small tiles.
    out_t = jax.block_until_ready(
        conv2d3x3(x, weight, bias, downsample=False, tile_rows=5))
    _check(out_t, _ref_conv(x, weight, bias, 1), (N, Cout, H, W))

    out_tds = jax.block_until_ready(
        conv2d3x3(x, weight, bias, downsample=True, tile_rows=3))
    _check(out_tds, _ref_conv(x, weight, bias, 2), (N, Cout, H // 2, W // 2))

    # Odd spatial / channel sizes exercise the Wt / Ho / Cout padding + crops.
    N2, Cin2, H2, W2, Cout2 = 1, 3, 9, 11, 5
    x2 = jax.random.normal(k_x2, (N2, Cin2, H2, W2), jnp.float32)
    w2, b2 = init_conv2d3x3_params(k_p2, Cin2, Cout2)

    out2 = jax.block_until_ready(conv2d3x3(x2, w2, b2, downsample=False))
    _check(out2, _ref_conv(x2, w2, b2, 1), (N2, Cout2, H2, W2))

    out2_ds = jax.block_until_ready(conv2d3x3(x2, w2, b2, downsample=True))
    _check(out2_ds, _ref_conv(x2, w2, b2, 2),
           (N2, Cout2, (H2 + 1) // 2, (W2 + 1) // 2))

    print("KERNEL_OK")
</pallas_src>

<mosaic_0001>
module attributes {stable_mosaic.version = 11 : i64} {
  func.func @_conv3x3_kernel(%arg0: i32, %arg1: i32, %arg2: i32, %arg3: memref<1x1x18x16x12xf32, #tpu.memory_space<vmem>>, %arg4: memref<3x12x128xf32, #tpu.memory_space<vmem>>, %arg5: memref<1x128xf32, #tpu.memory_space<vmem>>, %arg6: memref<1x16x16x128xf32, #tpu.memory_space<vmem>>) attributes {dimension_semantics = [#tpu.dimension_semantics<parallel>, #tpu.dimension_semantics<parallel>, #tpu.dimension_semantics<parallel>], iteration_bounds = array<i64: 2, 1, 1>, scalar_prefetch = 0 : i64, scratch_operands = 0 : i64, tpu.core_type = #tpu.core_type<tc>, window_params = [{transform_indices = @transform_0, window_bounds = array<i64: 1, 1, 18, 16, 12>}, {transform_indices = @transform_1, window_bounds = array<i64: 3, 12, 128>}, {transform_indices = @transform_2, window_bounds = array<i64: 1, 128>}, {transform_indices = @transform_3, window_bounds = array<i64: 1, 16, 16, 128>}]} {
    %c0 = arith.constant 0 : index
    %c0_0 = arith.constant 0 : index
    %c0_1 = arith.constant 0 : index
    %c0_2 = arith.constant 0 : index
    %c0_3 = arith.constant 0 : index
    %0 = vector.load %arg3[%c0, %c0_0, %c0_1, %c0_2, %c0_3] : memref<1x1x18x16x12xf32, #tpu.memory_space<vmem>>, vector<1x1x18x16x12xf32>
    %1 = vector.shape_cast %0 : vector<1x1x18x16x12xf32> to vector<18x16x12xf32>
    %cst = arith.constant 0.000000e+00 : f32
    %2 = vector.broadcast %cst : f32 to vector<256x128xf32>
    %3 = vector.extract_strided_slice %1 {offsets = [0, 0, 0], sizes = [16, 16, 12], strides = [1, 1, 1]} : vector<18x16x12xf32> to vector<16x16x12xf32>
    %4 = vector.shape_cast %3 : vector<16x16x12xf32> to vector<256x12xf32>
    %c0_4 = arith.constant 0 : index
    %c0_5 = arith.constant 0 : index
    %c0_6 = arith.constant 0 : index
    %5 = vector.load %arg4[%c0_4, %c0_5, %c0_6] : memref<3x12x128xf32, #tpu.memory_space<vmem>>, vector<1x12x128xf32>
    %6 = vector.shape_cast %5 : vector<1x12x128xf32> to vector<12x128xf32>
    %cst_7 = arith.constant dense<0.000000e+00> : vector<256x128xf32>
    %7 = tpu.matmul %4, %6, %cst_7 {dimension_numbers = #tpu.dot_dimension_numbers<[1], [0], [0], [1], [0, 0, 1, 1], [], []>} : vector<256x12xf32>, vector<12x128xf32>, vector<256x128xf32> -> vector<256x128xf32>
    %8 = arith.addf %2, %7 : vector<256x128xf32>
    %9 = vector.extract_strided_slice %1 {offsets = [1, 0, 0], sizes = [16, 16, 12], strides = [1, 1, 1]} : vector<18x16x12xf32> to vector<16x16x12xf32>
    %10 = vector.shape_cast %9 : vector<16x16x12xf32> to vector<256x12xf32>
    %c1 = arith.constant 1 : index
    %c0_8 = arith.constant 0 : index
    %c0_9 = arith.constant 0 : index
    %11 = vector.load %arg4[%c1, %c0_8, %c0_9] : memref<3x12x128xf32, #tpu.memory_space<vmem>>, vector<1x12x128xf32>
    %12 = vector.shape_cast %11 : vector<1x12x128xf32> to vector<12x128xf32>
    %cst_10 = arith.constant dense<0.000000e+00> : vector<256x128xf32>
    %13 = tpu.matmul %10, %12, %cst_10 {dimension_numbers = #tpu.dot_dimension_numbers<[1], [0], [0], [1], [0, 0, 1, 1], [], []>} : vector<256x12xf32>, vector<12x128xf32>, vector<256x128xf32> -> vector<256x128xf32>
    %14 = arith.addf %8, %13 : vector<256x128xf32>
    %15 = vector.extract_strided_slice %1 {offsets = [2, 0, 0], sizes = [16, 16, 12], strides = [1, 1, 1]} : vector<18x16x12xf32> to vector<16x16x12xf32>
    %16 = vector.shape_cast %15 : vector<16x16x12xf32> to vector<256x12xf32>
    %c2 = arith.constant 2 : index
    %c0_11 = arith.constant 0 : index
    %c0_12 = arith.constant 0 : index
    %17 = vector.load %arg4[%c2, %c0_11, %c0_12] : memref<3x12x128xf32, #tpu.memory_space<vmem>>, vector<1x12x128xf32>
    %18 = vector.shape_cast %17 : vector<1x12x128xf32> to vector<12x128xf32>
    %cst_13 = arith.constant dense<0.000000e+00> : vector<256x128xf32>
    %19 = tpu.matmul %16, %18, %cst_13 {dimension_numbers = #tpu.dot_dimension_numbers<[1], [0], [0], [1], [0, 0, 1, 1], [], []>} : vector<256x12xf32>, vector<12x128xf32>, vector<256x128xf32> -> vector<256x128xf32>
    %20 = arith.addf %14, %19 : vector<256x128xf32>
    %c0_14 = arith.constant 0 : index
    %c0_15 = arith.constant 0 : index
    %21 = vector.load %arg5[%c0_14, %c0_15] : memref<1x128xf32, #tpu.memory_space<vmem>>, vector<1x128xf32>
    %22 = vector.shape_cast %21 : vector<1x128xf32> to vector<128xf32>
    %23 = vector.shape_cast %22 : vector<128xf32> to vector<1x128xf32>
    %24 = vector.broadcast %23 : vector<1x128xf32> to vector<256x128xf32>
    %25 = arith.addf %20, %24 : vector<256x128xf32>
    %26 = vector.shape_cast %25 : vector<256x128xf32> to vector<16x16x128xf32>
    %c0_16 = arith.constant 0 : index
    %c0_17 = arith.constant 0 : index
    %c0_18 = arith.constant 0 : index
    %c0_19 = arith.constant 0 : index
    %27 = vector.load %arg6[%c0_16, %c0_17, %c0_18, %c0_19] : memref<1x16x16x128xf32, #tpu.memory_space<vmem>>, vector<1x16x16x128xf32>
    %28 = vector.shape_cast %27 : vector<1x16x16x128xf32> to vector<16x16x128xf32>
    %29 = vector.shape_cast %26 : vector<16x16x128xf32> to vector<1x16x16x128xf32>
    tpu.vector_store %arg6[%c0_16, %c0_17, %c0_18, %c0_19], %29 {strides = array<i32>} : memref<1x16x16x128xf32, #tpu.memory_space<vmem>>, vector<1x16x16x128xf32>,
    return
  }
  func.func @transform_0(%arg0: i32, %arg1: i32, %arg2: i32) -> (i32, i32, i32, i32, i32) {
    %c0_i32 = arith.constant 0 : i32
    %c0_i32_0 = arith.constant 0 : i32
    %c0_i32_1 = arith.constant 0 : i32
    %c0_i32_2 = arith.constant 0 : i32
    return %arg0, %arg1, %c0_i32, %c0_i32_0, %c0_i32_1 : i32, i32, i32, i32, i32
  }
  func.func @transform_1(%arg0: i32, %arg1: i32, %arg2: i32) -> (i32, i32, i32) {
    %c0_i32 = arith.constant 0 : i32
    %c0_i32_0 = arith.constant 0 : i32
    %c0_i32_1 = arith.constant 0 : i32
    return %c0_i32, %c0_i32_0, %arg2 : i32, i32, i32
  }
  func.func @transform_2(%arg0: i32, %arg1: i32, %arg2: i32) -> (i32, i32) {
    %c0_i32 = arith.constant 0 : i32
    %c0_i32_0 = arith.constant 0 : i32
    return %c0_i32, %arg2 : i32, i32
  }
  func.func @transform_3(%arg0: i32, %arg1: i32, %arg2: i32) -> (i32, i32, i32, i32) {
    %c0_i32 = arith.constant 0 : i32
    %c0_i32_0 = arith.constant 0 : i32
    return %arg0, %arg1, %c0_i32, %arg2 : i32, i32, i32, i32
  }
}

</mosaic_0001>

<bundles_post_ra>
// kernel: conv2d3x3.1
= control target key start
LH: loop header
LB: loop body
LE: loop exit
PB: predicated region body
PF: predicated region fallthrough
CT: control target
= control target key end

     0   :  { %s1863_s12 = smov 0   ;;  %s1865_s13 = smov 0   ;;  %s2146_s0 = inlined_call_operand.vmem [shape: f32[2,1,18,16,12], index: 0, kind: input, shape index: {}]   ;;  %s2147_s1 = inlined_call_operand.vmem [shape: f32[3,12,128], index: 1, kind: input, shape index: {}]   ;;  %s2148_s2 = inlined_call_operand.vmem [shape: f32[1,128], index: 2, kind: input, shape index: {}]   ;;  %s2149_s3 = inlined_call_operand.vmem [shape: f32[2,16,16,128], index: 3, kind: output, shape index: {}]  }
   0x1   :  { %s1867_s14 = smov 0  }
   0x2 LB: > { %s32_s15 = sadd.s32 1, %s1836_s13  ;;  %p1339_p0 = scmp.ge.s32.totalorder %s1840_s14, 1  ;;  %s1840_s14 = sphi %s1867_s14, %s13_s14   ;;  %s1836_s13 = sphi %s1865_s13, %s2153_s13   ;;  %s1832_s12 = sphi %s1863_s12, %s2152_s12  }
   0x3   : > { %p34_p1 = scmp.ge.s32.totalorder %s32_s15, 2  ;;  %p183_p2 = scmp.lt.s32.totalorder %s1840_s14, 3 }
   0x5   : > { %s2155_s15 = smov (%p34_p1, %s32_s15), 0  ;;  %p184_p3 = pnand %p1339_p0, %p183_p2 }
   0x6   : > { %v1343_v0 = vld [vmem:[%s2147_s1 + $0x10] sm:$0xff] (!%p184_p3)  ;;  %v1344_v1 = vld [vmem:[%s2147_s1 + $0x18] sm:$0xf] (!%p184_p3)  ;;  %vm394_vm0 = vcmask (!%p184_p3), 1043456   ;;  %v292_v2 = vld [vmem:[%s2147_s1] sm:$0xff] (!%p184_p3)  ;;  %vm1842_vm1 = vmmov (!%p184_p3), 1  }
   0x7   : > { %187 = sbr.rel (%p184_p3) target bundleno = 330 (0x14a), region = 32  ;;  %v1708_v3 = vpack.c.bf16 (!%p184_p3), %v1344_v1, %v1343_v0  ;;  %vm1890_vm2 = vmpackc.low (!%p184_p3), %vm394_vm0, %vm1842_vm1  ;;  %v293_v5 = vld [vmem:[%s2147_s1 + $0x8] sm:$0xf] (!%p184_p3)  ;;  %p226_p4 = scmp.lt.s32.totalorder (!%p184_p3), %s1832_s12, 1  ;;  %v1411_v6 = vld [vmem:[%s2147_s1 + $0x20] sm:$0xff] (!%p184_p3)  ;;  %vm297_vm3 = vcmask (!%p184_p3), 97280  }
   0x8   : > { %v1714_v7 = vpack.c.bf16 (!%p184_p3), %v293_v5, %v292_v2  ;;  %v1412_v8 = vld [vmem:[%s2147_s1 + $0x28] sm:$0xf] (!%p184_p3)  ;;  %v2065_v63 = vld [vmem:[%s2148_s2] ss:$0 sm:$0xff] (!%p184_p3) }
   0x9   : > { %1710 = vmatprep.subr.msk.bf16.mxu1 (!%p184_p3), %vm1890_vm2, %v1708_v3  ;;  %v1720_v9 = vpack.c.bf16 (!%p184_p3), %v1412_v8, %v1411_v6 }
   0xa   : > { %1716 = vmatprep.subr.msk.bf16.mxu0 (!%p184_p3), %vm1890_vm2, %v1714_v7  ;;  %1713 = vmatpush3.bf16.msk.msra.mxu1 (!%p184_p3), %vm1890_vm2, %v1708_v3 }
   0xb   : > { %1719 = vmatpush3.bf16.msk.msra.mxu0 (!%p184_p3), %vm1890_vm2, %v1714_v7  ;;  %1726 = vmatprep.subr.msk.bf16.mxu1 (!%p184_p3), %vm1890_vm2, %v1714_v7 }
   0xc   : > { %1722 = vmatprep.subr.msk.bf16.mxu0 (!%p184_p3), %vm1890_vm2, %v1720_v9 }
   0xe   : > { %s2157_s12 = smov (!%p226_p4, %s1832_s12), 1 }
   0xf   : > { %s1792_s28 = smul.u32 288, %s2157_s12  ;;  %s1449_s5 = sshll.u32 %s2157_s12, 8 }
  0x10   : > { %s2070_s10 = scalar_lea.vmem %s2149_s3, %s1449_s5 }
  0x11   : > { %s1921_s4 = scalar_lea.vmem %s2146_s0, %s1792_s28 }
  0x12   : > { %v258_v10 = vld [vmem:[%s1921_s4 + $0x10] sm:$0xff]  ;;  %v256_v11 = vld [vmem:[%s1921_s4] sm:$0xff]  ;;  %v259_v12 = vld [vmem:[%s1921_s4 + $0x18] sm:$0xff] }
  0x13   : > { %1556 = vmatprep.mubr.msk.f32.mxu1 %vm297_vm3, %v258_v10  ;;  %1608 = vmatprep.mubr.msk.f32.mxu0 %vm297_vm3, %v256_v11  ;;  %v257_v13 = vld [vmem:[%s1921_s4 + $0x8] sm:$0xff]  ;;  %v260_v14 = vld [vmem:[%s1921_s4 + $0x20] sm:$0xff]  ;;  %v262_v16 = vld [vmem:[%s1921_s4 + $0x30] sm:$0xff] }
  0x14   : > { %1557 = vmatmul.mubr.msk.f32.vlgmr.msra.gmra.mrb[0].mxu1 %vm297_vm3, %v259_v12  ;;  %1609 = vmatmul.mubr.msk.f32.vlgmr.msra.gmra.mrb[0].mxu0 %vm297_vm3, %v257_v13  ;;  %v261_v15 = vld [vmem:[%s1921_s4 + $0x28] sm:$0xff]  ;;  %v263_v17 = vld [vmem:[%s1921_s4 + $0x38] sm:$0xff]  ;;  %v264_v18 = vld [vmem:[%s1921_s4 + $0x40] sm:$0xff] }
  0x15   : > { %1727 = vmatpush3.bf16.msk.msra.mxu1 %vm1890_vm2, %v1714_v7  ;;  %1725 = vmatpush3.bf16.msk.msra.mxu0 %vm1890_vm2, %v1720_v9  ;;  %v265_v19 = vld [vmem:[%s1921_s4 + $0x48] sm:$0xff]  ;;  %v266_v20 = vld [vmem:[%s1921_s4 + $0x50] sm:$0xff]  ;;  %v267_v21 = vld [vmem:[%s1921_s4 + $0x58] sm:$0xff] }
  0x16   : > { %1559 = vmatprep.mubr.msk.f32.mxu1 %vm297_vm3, %v260_v14  ;;  %1611 = vmatprep.mubr.msk.f32.mxu0 %vm297_vm3, %v258_v10  ;;  %v268_v22 = vld [vmem:[%s1921_s4 + $0x60] sm:$0xff]  ;;  %v269_v23 = vld [vmem:[%s1921_s4 + $0x68] sm:$0xff]  ;;  %v270_v24 = vld [vmem:[%s1921_s4 + $0x70] sm:$0xff] }
  0x17   : > { %v271_v25 = vld [vmem:[%s1921_s4 + $0x78] sm:$0xff]  ;;  %v272_v26 = vld [vmem:[%s1921_s4 + $0x80] sm:$0xff]  ;;  %v273_v27 = vld [vmem:[%s1921_s4 + $0x88] sm:$0xff] }
  0x18   : > { %1560 = vmatmul.mubr.msk.f32.gmra.mrb[2].mxu1 %vm297_vm3, %v261_v15  ;;  %1612 = vmatmul.mubr.msk.f32.gmra.mrb[2].mxu0 %vm297_vm3, %v259_v12  ;;  %v274_v28 = vld [vmem:[%s1921_s4 + $0x90] sm:$0xff]  ;;  %v275_v29 = vld [vmem:[%s1921_s4 + $0x98] sm:$0xff]  ;;  %v276_v30 = vld [vmem:[%s1921_s4 + $0xa0] sm:$0xff] }
  0x19   : > { %1562 = vmatprep.mubr.msk.f32.mxu1 %vm297_vm3, %v262_v16  ;;  %1614 = vmatprep.mubr.msk.f32.mxu0 %vm297_vm3, %v260_v14  ;;  %v277_v31 = vld [vmem:[%s1921_s4 + $0xa8] sm:$0xff]  ;;  %v278_v32 = vld [vmem:[%s1921_s4 + $0xb0] sm:$0xff]  ;;  %v279_v33 = vld [vmem:[%s1921_s4 + $0xb8] sm:$0xff] }
  0x1a   : > { %v280_v34 = vld [vmem:[%s1921_s4 + $0xc0] sm:$0xff]  ;;  %v281_v35 = vld [vmem:[%s1921_s4 + $0xc8] sm:$0xff]  ;;  %v282_v36 = vld [vmem:[%s1921_s4 + $0xd0] sm:$0xff] }
  0x1b   : > { %v283_v37 = vld [vmem:[%s1921_s4 + $0xd8] sm:$0xff]  ;;  %v284_v38 = vld [vmem:[%s1921_s4 + $0xe0] sm:$0xff]  ;;  %v285_v39 = vld [vmem:[%s1921_s4 + $0xe8] sm:$0xff] }
  0x1c   : > { %1563 = vmatmul.mubr.msk.f32.gmra.mrb[4].mxu1 %vm297_vm3, %v263_v17  ;;  %1615 = vmatmul.mubr.msk.f32.gmra.mrb[4].mxu0 %vm297_vm3, %v261_v15  ;;  %v286_v40 = vld [vmem:[%s1921_s4 + $0xf0] sm:$0xff]  ;;  %v287_v41 = vld [vmem:[%s1921_s4 + $0xf8] sm:$0xff]  ;;  %v288_v42 = vld [vmem:[%s1921_s4 + $0x100] sm:$0xff] }
  0x1d   : > { %1565 = vmatprep.mubr.msk.f32.mxu1 %vm297_vm3, %v264_v18  ;;  %1617 = vmatprep.mubr.msk.f32.mxu0 %vm297_vm3, %v262_v16  ;;  %v289_v43 = vld [vmem:[%s1921_s4 + $0x108] sm:$0xff]  ;;  %v290_v44 = vld [vmem:[%s1921_s4 + $0x110] sm:$0xff]  ;;  %v291_v45 = vld [vmem:[%s1921_s4 + $0x118] sm:$0xff] }
  0x20   : > { %1566 = vmatmul.mubr.msk.f32.gmra.mrb[6].mxu1 %vm297_vm3, %v265_v19  ;;  %1618 = vmatmul.mubr.msk.f32.gmra.mrb[6].mxu0 %vm297_vm3, %v263_v17 }
  0x21   : > { %1568 = vmatprep.mubr.msk.f32.mxu1 %vm297_vm3, %v266_v20  ;;  %1620 = vmatprep.mubr.msk.f32.mxu0 %vm297_vm3, %v264_v18 }
  0x24   : > { %1569 = vmatmul.mubr.msk.f32.gmra.mrb[8].mxu1 %vm297_vm3, %v267_v21  ;;  %1621 = vmatmul.mubr.msk.f32.gmra.mrb[8].mxu0 %vm297_vm3, %v265_v19 }
  0x25   : > { %1571 = vmatprep.mubr.msk.f32.mxu1 %vm297_vm3, %v268_v22  ;;  %1623 = vmatprep.mubr.msk.f32.mxu0 %vm297_vm3, %v266_v20 }
  0x28   : > { %1572 = vmatmul.mubr.msk.f32.gmra.mrb[10].mxu1 %vm297_vm3, %v269_v23  ;;  %1624 = vmatmul.mubr.msk.f32.gmra.mrb[10].mxu0 %vm297_vm3, %v267_v21 }
  0x29   : > { %1574 = vmatprep.mubr.msk.f32.mxu1 %vm297_vm3, %v270_v24  ;;  %1626 = vmatprep.mubr.msk.f32.mxu0 %vm297_vm3, %v268_v22 }
  0x2c   : > { %1575 = vmatmul.mubr.msk.f32.gmra.mrb[12].mxu1 %vm297_vm3, %v271_v25  ;;  %1627 = vmatmul.mubr.msk.f32.gmra.mrb[12].mxu0 %vm297_vm3, %v269_v23 }
  0x2d   : > { %1577 = vmatprep.mubr.msk.f32.mxu1 %vm297_vm3, %v272_v26  ;;  %1629 = vmatprep.mubr.msk.f32.mxu0 %vm297_vm3, %v270_v24 }
  0x30   : > { %1578 = vmatmul.mubr.msk.f32.gmra.mrb[14].mxu1 %vm297_vm3, %v273_v27  ;;  %1630 = vmatmul.mubr.msk.f32.gmra.mrb[14].mxu0 %vm297_vm3, %v271_v25 }
  0x31   : > { %1580 = vmatprep.mubr.msk.f32.mxu1 %vm297_vm3, %v274_v28  ;;  %1660 = vmatprep.mubr.msk.f32.mxu0 %vm297_vm3, %v260_v14 }
  0x34   : > { %1581 = vmatmul.mubr.msk.f32.gmra.mrb[16].mxu1 %vm297_vm3, %v275_v29  ;;  %1661 = vmatmul.mubr.msk.f32.vlgmr.msra.gmra.mrb[0].mxu0 %vm297_vm3, %v261_v15 }
  0x35   : > { %1583 = vmatprep.mubr.msk.f32.mxu1 %vm297_vm3, %v276_v30  ;;  %1663 = vmatprep.mubr.msk.f32.mxu0 %vm297_vm3, %v262_v16 }
  0x38   : > { %1584 = vmatmul.mubr.msk.f32.gmra.mrb[18].mxu1 %vm297_vm3, %v277_v31  ;;  %1664 = vmatmul.mubr.msk.f32.gmra.mrb[2].mxu0 %vm297_vm3, %v263_v17 }
  0x39   : > { %1586 = vmatprep.mubr.msk.f32.mxu1 %vm297_vm3, %v278_v32  ;;  %1666 = vmatprep.mubr.msk.f32.mxu0 %vm297_vm3, %v264_v18 }
  0x3c   : > { %1587 = vmatmul.mubr.msk.f32.gmra.mrb[20].mxu1 %vm297_vm3, %v279_v33  ;;  %1667 = vmatmul.mubr.msk.f32.gmra.mrb[4].mxu0 %vm297_vm3, %v265_v19 }
  0x3d   : > { %1589 = vmatprep.mubr.msk.f32.mxu1 %vm297_vm3, %v280_v34  ;;  %1669 = vmatprep.mubr.msk.f32.mxu0 %vm297_vm3, %v266_v20 }
  0x40   : > { %1590 = vmatmul.mubr.msk.f32.gmra.mrb[22].mxu1 %vm297_vm3, %v281_v35  ;;  %1670 = vmatmul.mubr.msk.f32.gmra.mrb[6].mxu0 %vm297_vm3, %v267_v21 }
  0x41   : > { %1592 = vmatprep.mubr.msk.f32.mxu1 %vm297_vm3, %v282_v36  ;;  %1672 = vmatprep.mubr.msk.f32.mxu0 %vm297_vm3, %v268_v22 }
  0x44   : > { %1593 = vmatmul.mubr.msk.f32.gmra.mrb[24].mxu1 %vm297_vm3, %v283_v37  ;;  %1673 = vmatmul.mubr.msk.f32.gmra.mrb[8].mxu0 %vm297_vm3, %v269_v23 }
  0x45   : > { %1595 = vmatprep.mubr.msk.f32.mxu1 %vm297_vm3, %v284_v38  ;;  %1675 = vmatprep.mubr.msk.f32.mxu0 %vm297_vm3, %v270_v24 }
  0x48   : > { %1596 = vmatmul.mubr.msk.f32.gmra.mrb[26].mxu1 %vm297_vm3, %v285_v39  ;;  %1676 = vmatmul.mubr.msk.f32.gmra.mrb[10].mxu0 %vm297_vm3, %v271_v25 }
  0x49   : > { %1598 = vmatprep.mubr.msk.f32.mxu1 %vm297_vm3, %v286_v40  ;;  %1678 = vmatprep.mubr.msk.f32.mxu0 %vm297_vm3, %v272_v26 }
  0x4c   : > { %1599 = vmatmul.mubr.msk.f32.gmra.mrb[28].mxu1 %vm297_vm3, %v287_v41  ;;  %1679 = vmatmul.mubr.msk.f32.gmra.mrb[12].mxu0 %vm297_vm3, %v273_v27 }
  0x4d   : > { %1601 = vmatprep.mubr.msk.f32.mxu1 %vm297_vm3, %v288_v42  ;;  %1681 = vmatprep.mubr.msk.f32.mxu0 %vm297_vm3, %v274_v28 }
  0x50   : > { %1602 = vmatmul.mubr.msk.f32.gmra.mrb[30].mxu1 %vm297_vm3, %v289_v43  ;;  %1682 = vmatmul.mubr.msk.f32.gmra.mrb[14].mxu0 %vm297_vm3, %v275_v29 }
  0x51   : > { %1632 = vmatprep.mubr.msk.f32.mxu1 %vm297_vm3, %v272_v26  ;;  %1684 = vmatprep.mubr.msk.f32.mxu0 %vm297_vm3, %v276_v30 }
  0x54   : > { %1633 = vmatmul.mubr.msk.f32.vlgmr.msra.gmra.mrb[16].mxu1 %vm297_vm3, %v273_v27  ;;  %1685 = vmatmul.mubr.msk.f32.gmra.mrb[16].mxu0 %vm297_vm3, %v277_v31 }
  0x55   : > { %1635 = vmatprep.mubr.msk.f32.mxu1 %vm297_vm3, %v274_v28  ;;  %1687 = vmatprep.mubr.msk.f32.mxu0 %vm297_vm3, %v278_v32 }
  0x58   : > { %1636 = vmatmul.mubr.msk.f32.gmra.mrb[18].mxu1 %vm297_vm3, %v275_v29  ;;  %1688 = vmatmul.mubr.msk.f32.gmra.mrb[18].mxu0 %vm297_vm3, %v279_v33 }
  0x59   : > { %1638 = vmatprep.mubr.msk.f32.mxu1 %vm297_vm3, %v276_v30  ;;  %1690 = vmatprep.mubr.msk.f32.mxu0 %vm297_vm3, %v280_v34 }
  0x5c   : > { %1639 = vmatmul.mubr.msk.f32.gmra.mrb[20].mxu1 %vm297_vm3, %v277_v31  ;;  %1691 = vmatmul.mubr.msk.f32.gmra.mrb[20].mxu0 %vm297_vm3, %v281_v35 }
  0x5d   : > { %1641 = vmatprep.mubr.msk.f32.mxu1 %vm297_vm3, %v278_v32  ;;  %1693 = vmatprep.mubr.msk.f32.mxu0 %vm297_vm3, %v282_v36 }
  0x60   : > { %1642 = vmatmul.mubr.msk.f32.gmra.mrb[22].mxu1 %vm297_vm3, %v279_v33  ;;  %1694 = vmatmul.mubr.msk.f32.gmra.mrb[22].mxu0 %vm297_vm3, %v283_v37 }
  0x61   : > { %1644 = vmatprep.mubr.msk.f32.mxu1 %vm297_vm3, %v280_v34  ;;  %1696 = vmatprep.mubr.msk.f32.mxu0 %vm297_vm3, %v284_v38 }
  0x64   : > { %1645 = vmatmul.mubr.msk.f32.gmra.mrb[24].mxu1 %vm297_vm3, %v281_v35  ;;  %1697 = vmatmul.mubr.msk.f32.gmra.mrb[24].mxu0 %vm297_vm3, %v285_v39 }
  0x65   : > { %1647 = vmatprep.mubr.msk.f32.mxu1 %vm297_vm3, %v282_v36  ;;  %1699 = vmatprep.mubr.msk.f32.mxu0 %vm297_vm3, %v286_v40 }
  0x68   : > { %1648 = vmatmul.mubr.msk.f32.gmra.mrb[26].mxu1 %vm297_vm3, %v283_v37  ;;  %1700 = vmatmul.mubr.msk.f32.gmra.mrb[26].mxu0 %vm297_vm3, %v287_v41 }
  0x69   : > { %1650 = vmatprep.mubr.msk.f32.mxu1 %vm297_vm3, %v284_v38  ;;  %1702 = vmatprep.mubr.msk.f32.mxu0 %vm297_vm3, %v288_v42 }
  0x6c   : > { %1651 = vmatmul.mubr.msk.f32.gmra.mrb[28].mxu1 %vm297_vm3, %v285_v39  ;;  %1703 = vmatmul.mubr.msk.f32.gmra.mrb[28].mxu0 %vm297_vm3, %v289_v43 }
  0x6d   : > { %1653 = vmatprep.mubr.msk.f32.mxu1 %vm297_vm3, %v286_v40  ;;  %1705 = vmatprep.mubr.msk.f32.mxu0 %vm297_vm3, %v290_v44 }
  0x70   : > { %1654 = vmatmul.mubr.msk.f32.gmra.mrb[30].mxu1 %vm297_vm3, %v287_v41  ;;  %1706 = vmatmul.mubr.msk.f32.gmra.mrb[30].mxu0 %vm297_vm3, %v291_v45 }
  0xe7   : > { %v1558_v46 = vpop.f32.mrb[0].mxu1 }
  0xe8   : > { %v464_v47 = vpop.f32.mrb[1].mxu1 }
  0xeb   : > { %v1561_v48 = vpop.f32.mrb[2].mxu1 }
  0xec   : > { %v474_v49 = vpop.f32.mrb[3].mxu1 }
  0xef   : > { %v1564_v50 = vpop.f32.mrb[4].mxu1 }
  0xf0   : > { %v484_v51 = vpop.f32.mrb[5].mxu1 }
  0xf3   : > { %v1567_v52 = vpop.f32.mrb[6].mxu1 }
  0xf4   : > { %v494_v53 = vpop.f32.mrb[7].mxu1 }
  0xf7   : > { %v1570_v54 = vpop.f32.mrb[8].mxu1 }
  0xf8   : > { %v504_v55 = vpop.f32.mrb[9].mxu1 }
  0xfb   : > { %v1573_v56 = vpop.f32.mrb[10].mxu1 }
  0xfc   : > { %v514_v57 = vpop.f32.mrb[11].mxu1 }
  0xff   : > { %v1576_v58 = vpop.f32.mrb[12].mxu1 }
 0x100   : > { %v524_v59 = vpop.f32.mrb[13].mxu1 }
 0x103   : > { %v1579_v60 = vpop.f32.mrb[14].mxu1 }
 0x104   : > { %v2059_v61 = vpop.f32.mrb[15].mxu1 }
 0x107   : > { %v1662_v62 = vpop.f32.mrb[0].mxu0 }
 0x108   : > { %v1728_v0 = vadd.f32 %v1662_v62, %v1558_v46  ;;  %v935_v1 = vpop.f32.mrb[1].mxu0 }
 0x109   : > { %v1729_v2 = vadd.f32 %v935_v1, %v464_v47 }
 0x10a   : > { %v1134_v3 = vadd.f32 %v1728_v0, %v2065_v63 }
 0x10b   : > { %v1133_v4 = vadd.f32 %v1729_v2, %v2065_v63  ;;  %v1665_v5 = vpop.f32.mrb[2].mxu0 }
 0x10c   : > { %1166 = vst [vmem:[%s2070_s10 + $0x8] sm:$0xff] %v1134_v3  ;;  %v1730_v6 = vadd.f32 %v1665_v5, %v1561_v48  ;;  %v945_v7 = vpop.f32.mrb[3].mxu0 }
 0x10d   : > { %1165 = vst [vmem:[%s2070_s10] sm:$0xff] %v1133_v4  ;;  %v1731_v8 = vadd.f32 %v945_v7, %v474_v49 }
 0x10e   : > { %v1136_v9 = vadd.f32 %v1730_v6, %v2065_v63 }
 0x10f   : > { %v1135_v10 = vadd.f32 %v1731_v8, %v2065_v63  ;;  %v1668_v11 = vpop.f32.mrb[4].mxu0 }
 0x110   : > { %1168 = vst [vmem:[%s2070_s10 + $0x18] sm:$0xff] %v1136_v9  ;;  %v1732_v12 = vadd.f32 %v1668_v11, %v1564_v50  ;;  %v955_v13 = vpop.f32.mrb[5].mxu0 }
 0x111   : > { %1167 = vst [vmem:[%s2070_s10 + $0x10] sm:$0xff] %v1135_v10  ;;  %v1733_v14 = vadd.f32 %v955_v13, %v484_v51 }
 0x112   : > { %v1138_v15 = vadd.f32 %v1732_v12, %v2065_v63 }
 0x113   : > { %v1137_v16 = vadd.f32 %v1733_v14, %v2065_v63  ;;  %v1671_v17 = vpop.f32.mrb[6].mxu0 }
 0x114   : > { %1170 = vst [vmem:[%s2070_s10 + $0x28] sm:$0xff] %v1138_v15  ;;  %v1734_v18 = vadd.f32 %v1671_v17, %v1567_v52  ;;  %v965_v19 = vpop.f32.mrb[7].mxu0 }
 0x115   : > { %1169 = vst [vmem:[%s2070_s10 + $0x20] sm:$0xff] %v1137_v16  ;;  %v1735_v20 = vadd.f32 %v965_v19, %v494_v53 }
 0x116   : > { %v1140_v21 = vadd.f32 %v1734_v18, %v2065_v63 }
 0x117   : > { %v1139_v22 = vadd.f32 %v1735_v20, %v2065_v63  ;;  %v1674_v23 = vpop.f32.mrb[8].mxu0 }
 0x118   : > { %1172 = vst [vmem:[%s2070_s10 + $0x38] sm:$0xff] %v1140_v21  ;;  %v1736_v24 = vadd.f32 %v1674_v23, %v1570_v54  ;;  %v975_v25 = vpop.f32.mrb[9].mxu0 }
 0x119   : > { %1171 = vst [vmem:[%s2070_s10 + $0x30] sm:$0xff] %v1139_v22  ;;  %v1737_v26 = vadd.f32 %v975_v25, %v504_v55 }
 0x11a   : > { %v1142_v27 = vadd.f32 %v1736_v24, %v2065_v63 }
 0x11b   : > { %v1141_v28 = vadd.f32 %v1737_v26, %v2065_v63  ;;  %v1677_v29 = vpop.f32.mrb[10].mxu0 }
 0x11c   : > { %1174 = vst [vmem:[%s2070_s10 + $0x48] sm:$0xff] %v1142_v27  ;;  %v1738_v30 = vadd.f32 %v1677_v29, %v1573_v56  ;;  %v985_v31 = vpop.f32.mrb[11].mxu0 }
 0x11d   : > { %1173 = vst [vmem:[%s2070_s10 + $0x40] sm:$0xff] %v1141_v28  ;;  %v1739_v32 = vadd.f32 %v985_v31, %v514_v57 }
 0x11e   : > { %v1144_v33 = vadd.f32 %v1738_v30, %v2065_v63 }
 0x11f   : > { %v1143_v34 = vadd.f32 %v1739_v32, %v2065_v63  ;;  %v1680_v35 = vpop.f32.mrb[12].mxu0 }
 0x120   : > { %1176 = vst [vmem:[%s2070_s10 + $0x58] sm:$0xff] %v1144_v33  ;;  %v1740_v36 = vadd.f32 %v1680_v35, %v1576_v58  ;;  %v995_v37 = vpop.f32.mrb[13].mxu0 }
 0x121   : > { %1175 = vst [vmem:[%s2070_s10 + $0x50] sm:$0xff] %v1143_v34  ;;  %v1741_v38 = vadd.f32 %v995_v37, %v524_v59 }
 0x122   : > { %v1146_v39 = vadd.f32 %v1740_v36, %v2065_v63 }
 0x123   : > { %v1145_v40 = vadd.f32 %v1741_v38, %v2065_v63  ;;  %v1683_v41 = vpop.f32.mrb[14].mxu0 }
 0x124   : > { %1178 = vst [vmem:[%s2070_s10 + $0x68] sm:$0xff] %v1146_v39  ;;  %v1742_v42 = vadd.f32 %v1683_v41, %v1579_v60  ;;  %v1005_v43 = vpop.f32.mrb[15].mxu0 }
 0x125   : > { %1177 = vst [vmem:[%s2070_s10 + $0x60] sm:$0xff] %v1145_v40  ;;  %v1743_v44 = vadd.f32 %v1005_v43, %v2059_v61 }
 0x126   : > { %v1148_v45 = vadd.f32 %v1742_v42, %v2065_v63 }
 0x127   : > { %v1147_v46 = vadd.f32 %v1743_v44, %v2065_v63  ;;  %v1634_v47 = vpop.f32.mrb[16].mxu1  ;;  %v1686_v48 = vpop.f32.mrb[16].mxu0 }
 0x128   : > { %1180 = vst [vmem:[%s2070_s10 + $0x78] sm:$0xff] %v1148_v45  ;;  %v1744_v49 = vadd.f32 %v1686_v48, %v1634_v47  ;;  %v778_v50 = vpop.f32.mrb[17].mxu1  ;;  %v1015_v51 = vpop.f32.mrb[17].mxu0 }
 0x129   : > { %1179 = vst [vmem:[%s2070_s10 + $0x70] sm:$0xff] %v1147_v46  ;;  %v1745_v52 = vadd.f32 %v1015_v51, %v778_v50 }
 0x12a   : > { %v1150_v53 = vadd.f32 %v1744_v49, %v2065_v63 }
 0x12b   : > { %v1149_v54 = vadd.f32 %v1745_v52, %v2065_v63  ;;  %v1637_v55 = vpop.f32.mrb[18].mxu1  ;;  %v1689_v56 = vpop.f32.mrb[18].mxu0 }
 0x12c   : > { %1182 = vst [vmem:[%s2070_s10 + $0x88] sm:$0xff] %v1150_v53  ;;  %v1746_v57 = vadd.f32 %v1689_v56, %v1637_v55  ;;  %v788_v58 = vpop.f32.mrb[19].mxu1  ;;  %v1025_v59 = vpop.f32.mrb[19].mxu0 }
 0x12d   : > { %1181 = vst [vmem:[%s2070_s10 + $0x80] sm:$0xff] %v1149_v54  ;;  %v1747_v60 = vadd.f32 %v1025_v59, %v788_v58 }
 0x12e   : > { %v1152_v61 = vadd.f32 %v1746_v57, %v2065_v63 }
 0x12f   : > { %v1151_v62 = vadd.f32 %v1747_v60, %v2065_v63  ;;  %v1640_v0 = vpop.f32.mrb[20].mxu1  ;;  %v1692_v1 = vpop.f32.mrb[20].mxu0 }
 0x130   : > { %1184 = vst [vmem:[%s2070_s10 + $0x98] sm:$0xff] %v1152_v61  ;;  %v1748_v2 = vadd.f32 %v1692_v1, %v1640_v0  ;;  %v798_v3 = vpop.f32.mrb[21].mxu1  ;;  %v1035_v4 = vpop.f32.mrb[21].mxu0 }
 0x131   : > { %1183 = vst [vmem:[%s2070_s10 + $0x90] sm:$0xff] %v1151_v62  ;;  %v1749_v5 = vadd.f32 %v1035_v4, %v798_v3 }
 0x132   : > { %v1154_v6 = vadd.f32 %v1748_v2, %v2065_v63 }
 0x133   : > { %v1153_v7 = vadd.f32 %v1749_v5, %v2065_v63  ;;  %v1643_v8 = vpop.f32.mrb[22].mxu1  ;;  %v1695_v9 = vpop.f32.mrb[22].mxu0 }
 0x134   : > { %1186 = vst [vmem:[%s2070_s10 + $0xa8] sm:$0xff] %v1154_v6  ;;  %v1750_v10 = vadd.f32 %v1695_v9, %v1643_v8  ;;  %v808_v11 = vpop.f32.mrb[23].mxu1  ;;  %v1045_v12 = vpop.f32.mrb[23].mxu0 }
 0x135   : > { %1185 = vst [vmem:[%s2070_s10 + $0xa0] sm:$0xff] %v1153_v7  ;;  %v1751_v13 = vadd.f32 %v1045_v12, %v808_v11 }
 0x136   : > { %v1156_v14 = vadd.f32 %v1750_v10, %v2065_v63 }
 0x137   : > { %v1155_v15 = vadd.f32 %v1751_v13, %v2065_v63  ;;  %v1646_v16 = vpop.f32.mrb[24].mxu1  ;;  %v1698_v17 = vpop.f32.mrb[24].mxu0 }
 0x138   : > { %1188 = vst [vmem:[%s2070_s10 + $0xb8] sm:$0xff] %v1156_v14  ;;  %v1752_v18 = vadd.f32 %v1698_v17, %v1646_v16  ;;  %v818_v19 = vpop.f32.mrb[25].mxu1  ;;  %v1055_v20 = vpop.f32.mrb[25].mxu0 }
 0x139   : > { %1187 = vst [vmem:[%s2070_s10 + $0xb0] sm:$0xff] %v1155_v15  ;;  %v1753_v21 = vadd.f32 %v1055_v20, %v818_v19 }
 0x13a   : > { %v1158_v22 = vadd.f32 %v1752_v18, %v2065_v63 }
 0x13b   : > { %v1157_v23 = vadd.f32 %v1753_v21, %v2065_v63  ;;  %v1649_v24 = vpop.f32.mrb[26].mxu1  ;;  %v1701_v25 = vpop.f32.mrb[26].mxu0 }
 0x13c   : > { %1190 = vst [vmem:[%s2070_s10 + $0xc8] sm:$0xff] %v1158_v22  ;;  %v1754_v26 = vadd.f32 %v1701_v25, %v1649_v24  ;;  %v828_v27 = vpop.f32.mrb[27].mxu1  ;;  %v1065_v28 = vpop.f32.mrb[27].mxu0 }
 0x13d   : > { %1189 = vst [vmem:[%s2070_s10 + $0xc0] sm:$0xff] %v1157_v23  ;;  %v1755_v29 = vadd.f32 %v1065_v28, %v828_v27 }
 0x13e   : > { %v1160_v30 = vadd.f32 %v1754_v26, %v2065_v63 }
 0x13f   : > { %v1159_v31 = vadd.f32 %v1755_v29, %v2065_v63  ;;  %v1652_v32 = vpop.f32.mrb[28].mxu1  ;;  %v1704_v33 = vpop.f32.mrb[28].mxu0 }
 0x140   : > { %1192 = vst [vmem:[%s2070_s10 + $0xd8] sm:$0xff] %v1160_v30  ;;  %v1756_v34 = vadd.f32 %v1704_v33, %v1652_v32  ;;  %v838_v35 = vpop.f32.mrb[29].mxu1  ;;  %v1075_v36 = vpop.f32.mrb[29].mxu0 }
 0x141   : > { %1191 = vst [vmem:[%s2070_s10 + $0xd0] sm:$0xff] %v1159_v31  ;;  %v1757_v37 = vadd.f32 %v1075_v36, %v838_v35 }
 0x142   : > { %v1162_v38 = vadd.f32 %v1756_v34, %v2065_v63 }
 0x143   : > { %v1161_v39 = vadd.f32 %v1757_v37, %v2065_v63  ;;  %v1655_v40 = vpop.f32.mrb[30].mxu1  ;;  %v1707_v41 = vpop.f32.mrb[30].mxu0 }
 0x144   : > { %1194 = vst [vmem:[%s2070_s10 + $0xe8] sm:$0xff] %v1162_v38  ;;  %v1758_v42 = vadd.f32 %v1707_v41, %v1655_v40  ;;  %v848_v43 = vpop.f32.mrb[31].mxu1  ;;  %v1085_v44 = vpop.f32.mrb[31].mxu0 }
 0x145   : > { %1193 = vst [vmem:[%s2070_s10 + $0xe0] sm:$0xff] %v1161_v39  ;;  %v1759_v45 = vadd.f32 %v1085_v44, %v848_v43 }
 0x146   : > { %v1164_v46 = vadd.f32 %v1758_v42, %v2065_v63 }
 0x147   : > { %v1163_v47 = vadd.f32 %v1759_v45, %v2065_v63 }
 0x148   : > { %1196 = vst [vmem:[%s2070_s10 + $0xf8] sm:$0xff] %v1164_v46 }
 0x149   : > { %1195 = vst [vmem:[%s2070_s10 + $0xf0] sm:$0xff] %v1163_v47 }
 0x14a PF: > { %s13_s14 = sadd.s32 1, %s1840_s14   ;;  %s2152_s12 = smov %s1836_s13 }
 0x14b   : > { %p10_p5 = scmp.ge.s32.totalorder %s13_s14, 4   ;;  %s2153_s13 = smov %s2155_s15 }
 0x14d   :  { %12 = sbr.rel (!%p10_p5) target bundleno = 2 (0x2), region = 70 }

</bundles_post_ra>
